<compile_context>
chip_gen: v5e
topology: v5e:2x2
jax: 0.10.0
libtpu: 0.0.40
codegen_flags: <defaults>
</compile_context>

<pallas_src>
import functools

import jax
import jax.numpy as jnp
from jax import lax
from jax.experimental import pallas as pl
from jax.experimental.pallas import tpu as pltpu


def _embeddingbag_softmax_kernel(idx_ref, w_ref, out_ref, *, d_valid: int):
    idx = idx_ref[...]                      # (TB, L) int32
    w = w_ref[...]                          # (V_pad, D_pad) f32, pre-scaled by 1/L
    TB, L = idx.shape
    V_pad, D_pad = w.shape

    # counts[b, v] = #{l : idx[b, l] == v}; vocab on the lane axis, unrolled over L.
    lane_v = jax.lax.broadcasted_iota(jnp.int32, (TB, V_pad), 1)
    counts = jnp.zeros((TB, V_pad), jnp.float32)
    for l in range(L):                                      # static -> fully unrolled VPU
        counts = counts + (idx[:, l : l + 1] == lane_v).astype(jnp.float32)

    # EmbeddingBag mean as a single MXU matmul (1/L already folded into w).
    mean = jnp.dot(counts, w,
                   preferred_element_type=jnp.float32,
                   precision=lax.Precision.HIGHEST)         # exact f32 for 1e-5 tolerance

    # softmax over the embedding dim; padded lanes masked to -inf -> exp = 0.
    lane_d = jax.lax.broadcasted_iota(jnp.int32, (TB, D_pad), 1)
    logits = jnp.where(lane_d < d_valid, mean, -jnp.inf)
    m = jnp.max(logits, axis=1, keepdims=True)
    e = jnp.exp(logits - m)
    inv_denom = pl.reciprocal(jnp.sum(e, axis=1, keepdims=True), approx=False)
    out_ref[...] = (e * inv_denom).astype(out_ref.dtype)    # lane-dense, unmasked store


def _pick_row_tile(B: int, block_b: int) -> int:
    # Cap the tile at roughly B/2 (rounded down to a multiple of 8) so that
    # whenever B >= 16 the grid has >= 2 steps (v7x 2-TC sharding, pipelining),
    # and never exceed block_b (vreg-pressure bound, ~128-256 rows).
    half = max(8, (B // 2) // 8 * 8)
    tb = min(block_b, half)
    return max(8, (tb // 8) * 8)


def sparse_gradient_forward(indices, weight, *, block_b: int = 256):
    """indices: (B, L) int in [0, V); weight: (V, D) float32 -> (B, D) float32.

    TODO(synk): PyTorch EmbeddingBag's 1-D input + offsets form (variable bag
    sizes, padding_idx, per-sample weights) is not implemented; only the 2-D
    fixed-bag-length input used with SparseGradientModule is covered.
    """
    B, L = indices.shape
    V, D = weight.shape

    # Pad vocab to a sublane multiple (16) and embedding dim to 128 lanes;
    # fold the mode='mean' 1/L scale into the table (one-time host-side op).
    v_pad = ((V + 7) // 8) * 8
    d_pad = ((D + 127) // 128) * 128
    w_scaled = weight.astype(jnp.float32) * (1.0 / L)
    w_pad = jnp.zeros((v_pad, d_pad), jnp.float32).at[:V, :D].set(w_scaled)

    tb = _pick_row_tile(B, block_b)
    b_pad = ((B + tb - 1) // tb) * tb
    idx_i32 = indices.astype(jnp.int32)
    if b_pad != B:
        # Pad extra bags with index 0 (valid); their rows are sliced off below.
        idx_i32 = jnp.zeros((b_pad, L), jnp.int32).at[:B].set(idx_i32)

    grid = (b_pad // tb,)

    out_padded = pl.pallas_call(
        functools.partial(_embeddingbag_softmax_kernel, d_valid=D),
        out_shape=jax.ShapeDtypeStruct((b_pad, d_pad), jnp.float32),
        grid=grid,
        in_specs=[
            pl.BlockSpec((tb, L), lambda i: (i, 0)),        # bag tile over batch
            pl.BlockSpec((v_pad, d_pad), lambda i: (0, 0)),  # grid-invariant table (8 KiB)
        ],
        out_specs=pl.BlockSpec((tb, d_pad), lambda i: (i, 0)),
        compiler_params=pltpu.CompilerParams(
            dimension_semantics=("parallel",)               # shard bag tiles across TCs
        ),
    )(idx_i32, w_pad)

    return out_padded[:B, :D]


def reference_forward(indices, weight):
    gathered = weight[indices]                    # (B, L, D)
    mean = jnp.mean(gathered, axis=1)             # EmbeddingBag mode='mean'
    return jax.nn.softmax(mean, axis=1)


if __name__ == "__main__":
    key = jax.random.PRNGKey(0)
    k_w, k_idx = jax.random.split(key)

    V, D = 10, 10          # nn.EmbeddingBag(10, 10, sparse=True)
    B, L = 16, 8           # small 2-D bag input: 16 bags of 8 indices each

    weight = jax.random.normal(k_w, (V, D), dtype=jnp.float32)
    indices = jax.random.randint(k_idx, (B, L), 0, V, dtype=jnp.int32)

    # At B=16 the tile picker gives tb=8 -> grid=(2,), exercising the tiled /
    # parallel path; large-B calls use up to 256-row tiles with a >=2-step grid.
    out = sparse_gradient_forward(indices, weight)
    out = jax.block_until_ready(out)

    ref = reference_forward(indices, weight)
    assert out.shape == (B, D)
    assert jnp.allclose(out, ref, atol=1e-5, rtol=1e-5), "mismatch vs reference"

    print("KERNEL_OK")
</pallas_src>

<mosaic_0001>
module attributes {stable_mosaic.version = 11 : i64} {
  func.func @_embeddingbag_softmax_kernel(%arg0: i32, %arg1: memref<8x8xi32, #tpu.memory_space<vmem>>, %arg2: memref<16x128xf32, #tpu.memory_space<vmem>>, %arg3: memref<8x128xf32, #tpu.memory_space<vmem>>) attributes {dimension_semantics = [#tpu.dimension_semantics<parallel>], iteration_bounds = array<i64: 2>, scalar_prefetch = 0 : i64, scratch_operands = 0 : i64, tpu.core_type = #tpu.core_type<tc>, window_params = [{transform_indices = @transform_0, window_bounds = array<i64: 8, 8>}, {pipeline_mode = #tpu.pipeline_mode<synchronous>, transform_indices = @transform_1, window_bounds = array<i64: 16, 128>}, {transform_indices = @transform_2, window_bounds = array<i64: 8, 128>}]} {
    %c0 = arith.constant 0 : index
    %c0_0 = arith.constant 0 : index
    %0 = vector.load %arg1[%c0, %c0_0] : memref<8x8xi32, #tpu.memory_space<vmem>>, vector<8x8xi32>
    %c0_1 = arith.constant 0 : index
    %c0_2 = arith.constant 0 : index
    %1 = vector.load %arg2[%c0_1, %c0_2] : memref<16x128xf32, #tpu.memory_space<vmem>>, vector<16x128xf32>
    %2 = tpu.iota {dimensions = array<i32: 1>} : vector<8x16xi32>
    %cst = arith.constant 0.000000e+00 : f32
    %3 = vector.broadcast %cst : f32 to vector<8x16xf32>
    %4 = vector.extract_strided_slice %0 {offsets = [0, 0], sizes = [8, 1], strides = [1, 1]} : vector<8x8xi32> to vector<8x1xi32>
    %5 = vector.broadcast %4 : vector<8x1xi32> to vector<8x16xi32>
    %6 = arith.cmpi eq, %5, %2 : vector<8x16xi32>
    %7 = arith.extui %6 : vector<8x16xi1> to vector<8x16xi32>
    %8 = arith.sitofp %7 : vector<8x16xi32> to vector<8x16xf32>
    %9 = arith.addf %3, %8 : vector<8x16xf32>
    %10 = vector.extract_strided_slice %0 {offsets = [0, 1], sizes = [8, 1], strides = [1, 1]} : vector<8x8xi32> to vector<8x1xi32>
    %11 = vector.broadcast %10 : vector<8x1xi32> to vector<8x16xi32>
    %12 = arith.cmpi eq, %11, %2 : vector<8x16xi32>
    %13 = arith.extui %12 : vector<8x16xi1> to vector<8x16xi32>
    %14 = arith.sitofp %13 : vector<8x16xi32> to vector<8x16xf32>
    %15 = arith.addf %9, %14 : vector<8x16xf32>
    %16 = vector.extract_strided_slice %0 {offsets = [0, 2], sizes = [8, 1], strides = [1, 1]} : vector<8x8xi32> to vector<8x1xi32>
    %17 = vector.broadcast %16 : vector<8x1xi32> to vector<8x16xi32>
    %18 = arith.cmpi eq, %17, %2 : vector<8x16xi32>
    %19 = arith.extui %18 : vector<8x16xi1> to vector<8x16xi32>
    %20 = arith.sitofp %19 : vector<8x16xi32> to vector<8x16xf32>
    %21 = arith.addf %15, %20 : vector<8x16xf32>
    %22 = vector.extract_strided_slice %0 {offsets = [0, 3], sizes = [8, 1], strides = [1, 1]} : vector<8x8xi32> to vector<8x1xi32>
    %23 = vector.broadcast %22 : vector<8x1xi32> to vector<8x16xi32>
    %24 = arith.cmpi eq, %23, %2 : vector<8x16xi32>
    %25 = arith.extui %24 : vector<8x16xi1> to vector<8x16xi32>
    %26 = arith.sitofp %25 : vector<8x16xi32> to vector<8x16xf32>
    %27 = arith.addf %21, %26 : vector<8x16xf32>
    %28 = vector.extract_strided_slice %0 {offsets = [0, 4], sizes = [8, 1], strides = [1, 1]} : vector<8x8xi32> to vector<8x1xi32>
    %29 = vector.broadcast %28 : vector<8x1xi32> to vector<8x16xi32>
    %30 = arith.cmpi eq, %29, %2 : vector<8x16xi32>
    %31 = arith.extui %30 : vector<8x16xi1> to vector<8x16xi32>
    %32 = arith.sitofp %31 : vector<8x16xi32> to vector<8x16xf32>
    %33 = arith.addf %27, %32 : vector<8x16xf32>
    %34 = vector.extract_strided_slice %0 {offsets = [0, 5], sizes = [8, 1], strides = [1, 1]} : vector<8x8xi32> to vector<8x1xi32>
    %35 = vector.broadcast %34 : vector<8x1xi32> to vector<8x16xi32>
    %36 = arith.cmpi eq, %35, %2 : vector<8x16xi32>
    %37 = arith.extui %36 : vector<8x16xi1> to vector<8x16xi32>
    %38 = arith.sitofp %37 : vector<8x16xi32> to vector<8x16xf32>
    %39 = arith.addf %33, %38 : vector<8x16xf32>
    %40 = vector.extract_strided_slice %0 {offsets = [0, 6], sizes = [8, 1], strides = [1, 1]} : vector<8x8xi32> to vector<8x1xi32>
    %41 = vector.broadcast %40 : vector<8x1xi32> to vector<8x16xi32>
    %42 = arith.cmpi eq, %41, %2 : vector<8x16xi32>
    %43 = arith.extui %42 : vector<8x16xi1> to vector<8x16xi32>
    %44 = arith.sitofp %43 : vector<8x16xi32> to vector<8x16xf32>
    %45 = arith.addf %39, %44 : vector<8x16xf32>
    %46 = vector.extract_strided_slice %0 {offsets = [0, 7], sizes = [8, 1], strides = [1, 1]} : vector<8x8xi32> to vector<8x1xi32>
    %47 = vector.broadcast %46 : vector<8x1xi32> to vector<8x16xi32>
    %48 = arith.cmpi eq, %47, %2 : vector<8x16xi32>
    %49 = arith.extui %48 : vector<8x16xi1> to vector<8x16xi32>
    %50 = arith.sitofp %49 : vector<8x16xi32> to vector<8x16xf32>
    %51 = arith.addf %45, %50 : vector<8x16xf32>
    %cst_3 = arith.constant dense<0.000000e+00> : vector<8x128xf32>
    %52 = tpu.matmul %51, %1, %cst_3 {dimension_numbers = #tpu.dot_dimension_numbers<[1], [0], [0], [1], [0, 0, 1, 1], [], []>, precision = #tpu.contract_precision<fp32>} : vector<8x16xf32>, vector<16x128xf32>, vector<8x128xf32> -> vector<8x128xf32>
    %53 = tpu.iota {dimensions = array<i32: 1>} : vector<8x128xi32>
    %c10_i32 = arith.constant 10 : i32
    %54 = vector.broadcast %c10_i32 : i32 to vector<8x128xi32>
    %55 = arith.cmpi slt, %53, %54 : vector<8x128xi32>
    %cst_4 = arith.constant 0xFF800000 : f32
    %56 = vector.broadcast %cst_4 : f32 to vector<8x128xf32>
    %57 = arith.select %55, %52, %56 : vector<8x128xi1>, vector<8x128xf32>
    %cst_5 = arith.constant dense<0xFF800000> : vector<8xf32>
    %58 = vector.multi_reduction <maximumf>, %57, %cst_5 [1] : vector<8x128xf32> to vector<8xf32>
    %59 = vector.shape_cast %58 : vector<8xf32> to vector<8x1xf32>
    %60 = vector.broadcast %59 : vector<8x1xf32> to vector<8x128xf32>
    %61 = arith.subf %57, %60 : vector<8x128xf32>
    %62 = math.exp %61 : vector<8x128xf32>
    %cst_6 = arith.constant dense<0.000000e+00> : vector<8xf32>
    %63 = vector.multi_reduction <add>, %62, %cst_6 [1] : vector<8x128xf32> to vector<8xf32>
    %64 = vector.shape_cast %63 : vector<8xf32> to vector<8x1xf32>
    %65 = tpu.reciprocal %64 : vector<8x1xf32> -> vector<8x1xf32>
    %66 = vector.broadcast %65 : vector<8x1xf32> to vector<8x128xf32>
    %67 = arith.mulf %62, %66 : vector<8x128xf32>
    %c0_7 = arith.constant 0 : index
    %c0_8 = arith.constant 0 : index
    %68 = vector.load %arg3[%c0_7, %c0_8] : memref<8x128xf32, #tpu.memory_space<vmem>>, vector<8x128xf32>
    tpu.vector_store %arg3[%c0_7, %c0_8], %67 {strides = array<i32>} : memref<8x128xf32, #tpu.memory_space<vmem>>, vector<8x128xf32>,
    return
  }
  func.func @transform_0(%arg0: i32) -> (i32, i32) {
    %c0_i32 = arith.constant 0 : i32
    %c0_i32_0 = arith.constant 0 : i32
    return %arg0, %c0_i32 : i32, i32
  }
  func.func @transform_1(%arg0: i32) -> (i32, i32) {
    %c0_i32 = arith.constant 0 : i32
    %c0_i32_0 = arith.constant 0 : i32
    %c0_i32_1 = arith.constant 0 : i32
    return %c0_i32, %c0_i32_0 : i32, i32
  }
  func.func @transform_2(%arg0: i32) -> (i32, i32) {
    %c0_i32 = arith.constant 0 : i32
    %c0_i32_0 = arith.constant 0 : i32
    return %arg0, %c0_i32 : i32, i32
  }
}

</mosaic_0001>

<bundles_post_ra>
// kernel: tpu_custom_call.1
= control target key start
LH: loop header
LB: loop body
LE: loop exit
PB: predicated region body
PF: predicated region fallthrough
CT: control target
= control target key end

     0   :  { %7 = vsyncpa [#allocation3], 0  ;;  %s721_s0 = inlined_call_operand.vmem [shape: s32[16,8], index: 0, kind: input, shape index: {}]   ;;  %s722_s1 = inlined_call_operand.vmem [shape: f32[16,128], index: 1, kind: input, shape index: {}]   ;;  %s723_s2 = inlined_call_operand.hbm [shape: f32[16,128], index: 2, kind: output, shape index: {}]  }
   0x1   :  { %9 = vsyncpa [#allocation3 + $0x1], 0  ;;  %s630_s9 = smov 0   ;;  %s632_s10 = smov 0  }
   0x2   :  { %s634_s11 = smov 0   ;;  %s636_s12 = smov 0  }
   0x3 LB: > { %s651_s13 = sadd.s32 4294967295, %s604_s12   ;;  %s463_s14 = sadd.s32 4294967294, %s604_s12   ;;  %s604_s12 = sphi %s636_s12, %s729_s12   ;;  %s600_s11 = sphi %s634_s11, %s728_s11   ;;  %s596_s10 = sphi %s632_s10, %s727_s10   ;;  %s592_s9 = sphi %s630_s9, %s726_s9  }
   0x4   : > { %s655_s15 = sadd.s32 1, %s604_s12   ;;  %s69_s16 = sadd.s32 1, %s600_s11 }
   0x5   : > { %s66_s17 = ssub.s32 %s604_s12, %s655_s15  ;;  %p79_p0 = scmp.ne.s32.totalorder %s600_s11, %s596_s10 }
   0x6   : > { %p67_p1 = scmp.eq.s32.totalorder %s66_s17, 0  ;;  %p80_p2 = scmp.eq.s32.totalorder %s651_s13, 1 }
   0x7   : > { %p85_p3 = scmp.ne.s32.totalorder %s596_s10, %s592_s9  ;;  %p86_p4 = scmp.eq.s32.totalorder %s463_s14, 1 }
   0x8   : > { %s666_s18 = scalar_select %p67_p1, %s600_s11, %s69_s16  }
   0x9   : > { %p668_p5 = por %p80_p2, %p79_p0  ;;  %p672_p6 = por %p86_p4, %p85_p3 }
   0xa   : > { %p466_p7 = scmp.ge.s32.totalorder %s604_s12, 1  ;;  %p114_p8 = scmp.lt.s32.totalorder %s604_s12, 3 }
   0xc   : > { %p115_p9 = pnand %p466_p7, %p114_p8 }
   0xd   : > { %p135_p10 = scmp.lt.s32.totalorder (!%p115_p9), %s651_s13, 1  ;;  %s132_s30 = sand.u32 (!%p115_p9), 1, %s596_s10  }
   0xe   : > { %118 = sbr.rel (%p115_p9) target bundleno = 579 (0x243), region = 28  ;;  %s467_s3 = sshll.u32 (!%p115_p9), %s132_s30, 3 }
   0xf   : > { %s478_s4 = sshll.u32 (!%p115_p9), %s651_s13, 3  ;;  %s134_s8 = scalar_lea.vmem (!%p115_p9), [#allocation2], %s467_s3 }
  0x10   : > { %s399_s7 = scalar_lea.hbm (!%p115_p9), %s723_s2, %s478_s4  ;;  %s401_s14 = sshll.u32 (!%p115_p9), %s134_s8, 4  ;;  %s402_s14 = int_to_ptr.vmem [resolvable:$true] %s401_s14 }
  0x11   : > { %s403_s16 = sshll.u32 (!%p115_p9), %s399_s7, 4  ;;  %s562_s24 = scalar_lea.hbm (!%p115_p9), %s723_s2, 16  ;;  %s404_s16 = int_to_ptr.hbm [resolvable:$true] %s403_s16 }
  0x12   : > { %s556_s17 = sshra.s32 (!%p115_p9), %s404_s16, 4  ;;  %s557_s17 = int_to_ptr.hbm [resolvable:$true] %s556_s17 }
  0x13   : > { %v606_v0 = vmov 0   ;;  %v607_v1 = vmov 2   ;;  %s136_s21 = scalar_select %p135_p10, %s651_s13, 1  ;;  %v608_v2 = vmov 4   ;;  %v609_v4 = vmov 1   ;;  %v141_v9 = vld [vmem:[%s722_s1 + $0x8] sm:$0xff] }
  0x14   : > { %529 = vset.pattern.permute.xlu0 %v606_v0  ;;  %531 = vset.pattern.permute.xlu1 %v607_v1  ;;  %v610_v5 = vmov 3   ;;  %v611_v6 = vmov 5   ;;  %v612_v7 = vmov 6   ;;  %v613_v8 = vmov 7   ;;  %v140_v11 = vld [vmem:[%s722_s1] sm:$0xff]  ;;  %s389_s13 = scalar_lea.sflag [#allocation3], %s132_s30  ;;  %p563_p0 = scmp.lt.s32.totalorder %s557_s17, %s723_s2 }
  0x15   : > { %533 = vset.pattern.permute.xlu2 %v608_v2  ;;  %s468_s22 = sshll.u32 %s136_s21, 3  ;;  %v218_v10 = vand.u32 4294901760, %v141_v9  ;;  %v220_v13 = vand.u32 4294901760, %v140_v11  ;;  %v142_v22 = vlaneseq  ;;  %v614_v29 = vmov 0.0   ;;  %s558_s21 = scalar_lea.hbm %s557_s17, 8 }
  0x16   : > { %s138_s25 = scalar_lea.vmem %s721_s0, %s468_s22  ;;  %vm200_vm8 = vcmask 130048   ;;  %p559_p11 = scmp.ne.s32.totalorder %s557_s17, %s558_s21 }
  0x17   : > { %v139_v3 = vld [vmem:[%s138_s25] sm:$0xff]  ;;  %v246_v12 = vsub.f32 %v141_v9, %v218_v10  ;;  %303 = vmatpush.msra.mxu3 %v218_v10  ;;  %219 = vmatpush.msra.mxu0 %v218_v10  ;;  %v252_v15 = vsub.f32 %v140_v11, %v220_v13  ;;  %v143_v25 = vand.u32 127, %v142_v22  ;;  %p564_p1 = scmp.lt.s32.totalorder %s562_s24, %s558_s21 }
  0x18   : > { %145 = vperm.xlu0 %529, %v139_v3   ;;  %159 = vperm.xlu1 %531, %v139_v3   ;;  %p560_p12 = pnand %p559_p11, %p668_p5 }
  0x19   : > { %173 = vperm.xlu2 %533, %v139_v3   ;;  %v247_v14 = vand.u32 4294901760, %v246_v12  ;;  %278 = vmatpush.msra.mxu2 %v246_v12  ;;  %v253_v17 = vand.u32 4294901760, %v252_v15  ;;  %vm363_vm9 = vcmp.lt.s32.totalorder %v143_v25, 10  ;;  %p565_p2 = por %p564_p1, %p563_p0 }
  0x1a   : > { %305 = vmatpush.msra.mxu3 %v220_v13  ;;  %221 = vmatpush.msra.mxu0 %v220_v13  ;;  %p561_p13 = pneg %p560_p12 }
  0x1b   : > { %v248_v16 = vsub.f32 %v246_v12, %v247_v14  ;;  %281 = vmatpush.msra.mxu2 %v252_v15  ;;  %v254_v19 = vsub.f32 %v252_v15, %v253_v17 }
  0x1c   : > { %330 = vmatpush.msrb.mxu0 %v247_v14  ;;  %p566_p3 = pnand %p565_p2, %p561_p13 }
  0x1d   : > { %v249_v18 = vand.u32 4294901760, %v248_v16  ;;  %v255_v20 = vand.u32 4294901760, %v254_v19 }
  0x1e   : > { %334 = vmatpush.msrb.mxu0 %v253_v17 }
  0x1f   : > { %250 = vmatpush.msra.mxu1 %v249_v18 }
  0x20   : > { %530 = vset.pattern.permute.xlu0 %v609_v4  ;;  %532 = vset.pattern.permute.xlu1 %v610_v5 }
  0x21   : > { %152 = vperm.xlu0 %530, %v139_v3   ;;  %166 = vperm.xlu1 %532, %v139_v3  }
  0x22   : > { %534 = vset.pattern.permute.xlu2 %v611_v6  ;;  %256 = vmatpush.msra.mxu1 %v255_v20 }
  0x23   : > { %180 = vperm.xlu2 %534, %v139_v3  }
  0x24   : > { %355 = vmatpush.msrb.mxu1 %v218_v10 }
  0x26   : > { %357 = vmatpush.msrb.mxu1 %v220_v13 }
  0x29   : > { %535 = vset.pattern.permute.xlu1 %v612_v7  ;;  %537 = vset.pattern.permute.xlu0 %v613_v8 }
  0x2a   : > { %187 = vperm.xlu1 %535, %v139_v3  }
  0x2b   : > { %536 = vset.pattern.permute.xlu2 %v613_v8 }
  0x2c   : > { %194 = vperm.xlu2 %536, %v139_v3  }
  0x73   : > { %v174_v21 = vpop.permute.xlu2 %173 }
  0x74   : > { %vm175_vm4 = vcmp.eq.s32.totalorder %v174_v21, %v143_v25 }
  0x75   : > { %v473_v38 = vsel %vm175_vm4, 1.0, %v614_v29 }
  0x7d   : > { %v181_v26 = vpop.permute.xlu2 %180 }
  0x7e   : > { %vm182_vm5 = vcmp.eq.s32.totalorder %v181_v26, %v143_v25 }
  0x7f   : > { %v474_v41 = vsel %vm182_vm5, 1.0, %v614_v29 }
  0x86   : > { %v195_v36 = vpop.permute.xlu2 %194 }
  0x87   : > { %vm196_vm6 = vcmp.eq.s32.totalorder %v195_v36, %v143_v25 }
  0x88   : > { %v476_v44 = vsel %vm196_vm6, 1.0, %v614_v29 }
  0x8a   : > { %v146_v23 = vpop.permute.xlu0 %145  ;;  %v160_v24 = vpop.permute.xlu1 %159 }
  0x8b   : > { %vm147_vm0 = vcmp.eq.s32.totalorder %v146_v23, %v143_v25  ;;  %vm161_vm1 = vcmp.eq.s32.totalorder %v160_v24, %v143_v25 }
  0x8c   : > { %v469_v30 = vsel %vm147_vm0, 1.0, %v614_v29  ;;  %v471_v33 = vsel %vm161_vm1, 1.0, %v614_v29 }
  0x93   : > { %v153_v27 = vpop.permute.xlu0 %152  ;;  %v167_v28 = vpop.permute.xlu1 %166 }
  0x94   : > { %vm154_vm2 = vcmp.eq.s32.totalorder %v153_v27, %v143_v25  ;;  %vm168_vm3 = vcmp.eq.s32.totalorder %v167_v28, %v143_v25 }
  0x95   : > { %v470_v31 = vsel %vm154_vm2, 1.0, %v614_v29  ;;  %v472_v35 = vsel %vm168_vm3, 1.0, %v614_v29 }
  0x96   : > { %v157_v32 = vadd.f32 %v470_v31, %v469_v30 }
  0x98   : > { %v164_v34 = vadd.f32 %v471_v33, %v157_v32 }
  0x9a   : > { %v171_v37 = vadd.f32 %v472_v35, %v164_v34 }
  0x9c   : > { %v178_v39 = vadd.f32 %v473_v38, %v171_v37  ;;  %v188_v40 = vpop.permute.xlu1 %187 }
  0x9d   : > { %vm189_vm7 = vcmp.eq.s32.totalorder %v188_v40, %v143_v25 }
  0x9e   : > { %v185_v42 = vadd.f32 %v474_v41, %v178_v39  ;;  %v475_v43 = vsel %vm189_vm7, 1.0, %v614_v29 }
  0xa0   : > { %v192_v45 = vadd.f32 %v475_v43, %v185_v42 }
  0xa2   : > { %v199_v46 = vadd.f32 %v476_v44, %v192_v45 }
  0xa4   : > { %v202_v47 = vsel %vm200_vm8, %v199_v46, 0 }
  0xa5   : > { %v222_v48 = vand.u32 4294901760, %v202_v47 }
  0xa7   : > { %258 = vmatmul.f32.vlgmr.msra.gmra.mxu1 %v222_v48  ;;  %v223_v49 = vsub.f32 %v202_v47, %v222_v48 }
  0xa9   : > { %284 = vmatmul.f32.vlgmr.msra.gmra.mxu2 %v223_v49  ;;  %v224_v50 = vand.u32 4294901760, %v223_v49 }
  0xab   : > { %309 = vmatmul.f32.vlgmr.msra.gmra.mxu3 %v224_v50  ;;  %v225_v51 = vsub.f32 %v223_v49, %v224_v50 }
  0xad   : > { %v226_v52 = vand.u32 4294901760, %v225_v51 }
  0xaf   : > { %227 = vmatmul.f32.vlgmr.msra.gmra.mxu0 %v226_v52  ;;  %359 = vmatmul.f32.vlgmr.msrb.gmra.mxu1 %v222_v48 }
  0xb7   : > { %336 = vmatmul.f32.vlgmr.msrb.gmra.mxu0 %v222_v48 }
 0x124   : > { %v259_v53 = vpop.f32.mrf.mxu1 }
 0x12c   : > { %v228_v54 = vpop.f32.mrf.mxu0  ;;  %v285_v56 = vpop.f32.mrf.mxu2 }
 0x12d   : > { %v260_v55 = vadd.f32 %v259_v53, %v228_v54  ;;  %v360_v62 = vpop.f32.mrf.mxu1 }
 0x12e   : > { %v310_v58 = vpop.f32.mrf.mxu3 }
 0x12f   : > { %v286_v57 = vadd.f32 %v285_v56, %v260_v55 }
 0x131   : > { %v311_v59 = vadd.f32 %v310_v58, %v286_v57 }
 0x134   : > { %v337_v60 = vpop.f32.mrf.mxu0 }
 0x135   : > { %v338_v61 = vadd.f32 %v337_v60, %v311_v59 }
 0x137   : > { %v361_v63 = vadd.f32 %v360_v62, %v338_v61 }
 0x139   : > { %v364_v0 = vsel %vm363_vm9, %v361_v63, -inf }
 0x13a   : > { %365 = vmax.xlane.f32.xlu0 %v364_v0 }
 0x1ad   : > { %v366_v1 = vpop.xlane.xlu0 %365 }
 0x1ae   : > { %v367_v2 = vsub.f32 %v364_v0, %v366_v1 }
 0x1b0   : > { %v368_v3 = vmul.f32 1.442695, %v367_v2 }
 0x1b2   : > { %538 = vpow2.f32 %v368_v3 }
 0x1b8   : > { %v539_v4 = vpop.eup %538 }
 0x1b9   : > { %370 = vadd.xlane.f32.xlu1 %v539_v4 }
 0x22c   : > { %v371_v5 = vpop.xlane.xlu1 %370 }
 0x22d   : > { %540 = vrcp.f32 %v371_v5  ;;  %v383_v9 = vand.u32 2147483648, %v371_v5  ;;  %v381_v11 = vand.u32 2147483647, %v371_v5  ;;  %vm377_vm11 = vweird.f32 %v371_v5 }
 0x22f   : > { %v384_v13 = vor.u32 1.1754944e-38, %v383_v9  ;;  %vm382_vm13 = vcmp.eq.f32.partialorder %v381_v11, 8.507059e+37 }
 0x233   : > { %v541_v6 = vpop.eup %540 }
 0x234   : > { %v373_v7 = vmul.f32 %v541_v6, %v371_v5  ;;  %vm378_vm10 = vweird.f32 %v541_v6 }
 0x235   : > { %vm379_vm12 = vmor %vm377_vm11, %vm378_vm10 }
 0x236   : > { %v374_v8 = vsub.f32 1.0, %v373_v7 }
 0x238   : > { %v375_v10 = vmul.f32 %v541_v6, %v374_v8 }
 0x23a   : > { %v376_v12 = vadd.f32 %v541_v6, %v375_v10 }
 0x23c   : > { %v380_v14 = vsel %vm379_vm12, %v541_v6, %v376_v12 }
 0x23d   : > { %v385_v15 = vsel %vm382_vm13, %v384_v13, %v380_v14 }
 0x23e   : > { %v386_v16 = vmul.f32 %v539_v4, %v385_v15 }
 0x240   : > { %387 = vst [vmem:[%s134_s8] sm:$0xff] %v386_v16 }
 0x241   : > { %569 = shalt.err (!%p566_p3)
}
 0x242   : > { %481 = dma.vmem_to_hbm [thread:$0]  (%p668_p5), %s402_s14, 128, %s404_s16, %s389_s13  }
 0x243 PF: > { %p487_p4 = scmp.ge.s32.totalorder %s604_s12, 2  ;;  %s415_s27 = sand.u32 1, %s592_s9  }
 0x244   : > { %s416_s28 = scalar_lea.sflag [#allocation3], %s415_s27 }
 0x245   : > { %p484_p7 = pnand %p487_p4, %p672_p6 }
 0x247   : > { %p485_p8 = pneg %p484_p7 }
 0x249   : > { %587 = dma.done.wait (%p485_p8), %s416_s28, 128  }
 0x24a   : > { %589 = vsyncadd (%p485_p8), %s416_s28, 4294967168  ;;  %p12_p9 = scmp.ge.s32.totalorder %s655_s15, 4   ;;  %s726_s9 = smov %s596_s10 }
 0x24b   : > { %s727_s10 = smov %s600_s11  ;;  %s728_s11 = smov %s666_s18 }
 0x24c   : > { %s729_s12 = smov %s655_s15  ;;  %14 = sbr.rel (!%p12_p9) target bundleno = 3 (0x3), region = 63 }
 0x251   :  { %422 = vsyncpa [#allocation3], 1 }
 0x252   :  { %424 = vsyncpa [#allocation3 + $0x1], 1 }

</bundles_post_ra>
